<compile_context>
chip_gen: v7x
topology: tpu7x:2x2x1
jax: 0.10.0
libtpu: 0.0.40
codegen_flags: <defaults>
</compile_context>

<pallas_src>
import jax
import jax.numpy as jnp
from jax.experimental import pallas as pl
from jax.experimental.pallas import tpu as pltpu


def _mpu_kernel(u_ref, p_ref, w_ref, b_ref, out_ref, gate_ref):
    # ReLU in native dtype (bf16 inputs -> bf16 MXU matmul), f32 accumulation.
    u = jnp.maximum(u_ref[...], 0)
    p = jnp.maximum(p_ref[...], 0)
    w = w_ref[...]
    b = b_ref[...].astype(jnp.float32)          # (1, F)

    if u.shape[0] == p.shape[0]:
        # Fused: one weight push, (2*tile, D) LHS -> doubled MXU occupancy.
        nu = u.shape[0]
        proj = jnp.dot(jnp.concatenate([u, p], axis=0), w,
                       preferred_element_type=jnp.float32) + b
        gu, gp = proj[:nu], proj[nu:]
    else:
        # Broadcast path: one side is a single resident (1, D) row.
        gu = jnp.dot(u, w, preferred_element_type=jnp.float32) + b
        gp = jnp.dot(p, w, preferred_element_type=jnp.float32) + b

    # Per-row gate; jnp broadcasting covers the single-row ("expand") cases.
    gate = jax.nn.sigmoid(jnp.sum(gu * gp, axis=1, keepdims=True))   # (rows, 1)

    gate_ref[...] = gate.astype(gate_ref.dtype)
    # Output uses the *un-ReLU'd* pair term, as in the PyTorch module.
    out_ref[...] = (p_ref[...].astype(jnp.float32) * gate).astype(out_ref.dtype)


def _round_up(x, m):
    return ((x + m - 1) // m) * m


def message_passing_unit_v2(unary_term, pair_term, w, b, *, tile_m=512,
                            vmem_budget_bytes=24 * 1024 * 1024):
    """JAX wrapper reproducing MessagePassingUnit_v2.forward.

    unary_term: (Nu, D), pair_term: (Np, D), w: (D, F), b: (F,)
    returns (output (N, D), gate (N,))
    """
    Nu, D = unary_term.shape
    Np, Dp = pair_term.shape
    assert D == Dp and w.shape[0] == D
    F_dim = w.shape[1]

    # PyTorch `expand` semantics, but WITHOUT materializing an N x D copy:
    # the single-row side keeps shape (1, D) and is broadcast in-kernel.
    bcast_u = (Nu == 1 and Np > 1)
    bcast_p = (Np == 1 and Nu > 1)
    if not (bcast_u or bcast_p):
        assert Nu == Np, "row counts must match unless one side has 1 row"
    N_out = Nu if bcast_p else Np

    out_dtype = pair_term.dtype
    in_bytes = jnp.dtype(unary_term.dtype).itemsize
    out_bytes = jnp.dtype(out_dtype).itemsize
    w_bytes = jnp.dtype(w.dtype).itemsize

    # --- tile selection: as large as fits the VMEM budget (HBM-bound) ---------
    def _need(t):
        # double-buffered streamed inputs/outputs + in-flight f32 temporaries
        stream = 2 * ((0 if bcast_u else t * D * in_bytes)
                      + (0 if bcast_p else t * D * in_bytes)
                      + t * D * out_bytes + t * 4)
        temps = 3 * t * F_dim * 4 + 3 * t * D * 4
        return stream + temps

    tile = max(8, _round_up(min(int(tile_m), _round_up(N_out, 8)), 8))
    while tile > 8 and _need(tile) > vmem_budget_bytes:
        tile = _round_up(tile // 2, 8)

    grid = (pl.cdiv(N_out, tile),)

    b2 = b.reshape(1, F_dim)

    u_spec = (pl.BlockSpec((1, D), lambda i: (0, 0)) if bcast_u
              else pl.BlockSpec((tile, D), lambda i: (i, 0)))
    p_spec = (pl.BlockSpec((1, D), lambda i: (0, 0)) if bcast_p
              else pl.BlockSpec((tile, D), lambda i: (i, 0)))

    resident = 2 * (D * F_dim + F_dim) * w_bytes       # weight/bias buffers
    vmem_limit = int(min(64 * 2**20,
                         max(32 * 2**20, 2 * (_need(tile) + resident))))

    out, gate = pl.pallas_call(
        _mpu_kernel,
        out_shape=(
            jax.ShapeDtypeStruct((N_out, D), out_dtype),
            jax.ShapeDtypeStruct((N_out, 1), jnp.float32),
        ),
        grid_spec=pltpu.PrefetchScalarGridSpec(
            num_scalar_prefetch=0,
            grid=grid,
            in_specs=[
                u_spec,                                       # unary rows
                p_spec,                                       # pair rows
                pl.BlockSpec((D, F_dim), lambda i: (0, 0)),   # weight (resident)
                pl.BlockSpec((1, F_dim), lambda i: (0, 0)),   # bias (resident)
            ],
            out_specs=(
                pl.BlockSpec((tile, D), lambda i: (i, 0)),
                pl.BlockSpec((tile, 1), lambda i: (i, 0)),
            ),
        ),
        compiler_params=pltpu.CompilerParams(
            dimension_semantics=("parallel",),
            vmem_limit_bytes=vmem_limit),
    )(unary_term, pair_term, w, b2)

    return out, gate.reshape(N_out)


def _reference(unary_term, pair_term, w, b):
    if unary_term.shape[0] == 1 and pair_term.shape[0] > 1:
        unary_term = jnp.broadcast_to(
            unary_term, (pair_term.shape[0], unary_term.shape[1]))
    if unary_term.shape[0] > 1 and pair_term.shape[0] == 1:
        pair_term = jnp.broadcast_to(
            pair_term, (unary_term.shape[0], pair_term.shape[1]))
    gu = jnp.maximum(unary_term, 0.0) @ w + b
    gp = jnp.maximum(pair_term, 0.0) @ w + b
    gate = jax.nn.sigmoid(jnp.sum(gu * gp, axis=1))
    out = pair_term * gate[:, None]
    return out, gate


if __name__ == "__main__":
    # Small shapes: input_dim=32, filter_dim=128 (module default).
    INPUT_DIM, FILTER_DIM = 32, 128

    key = jax.random.PRNGKey(0)
    k_u, k_p, k_w, k_b, k_u2, k_p2 = jax.random.split(key, 6)

    # Deterministic nn.Linear-style init: U(-1/sqrt(D), 1/sqrt(D)).
    bound = 1.0 / (INPUT_DIM ** 0.5)
    w = jax.random.uniform(k_w, (INPUT_DIM, FILTER_DIM), jnp.float32,
                           minval=-bound, maxval=bound)
    b = jax.random.uniform(k_b, (FILTER_DIM,), jnp.float32,
                           minval=-bound, maxval=bound)

    def check(unary, pair, **kw):
        out, gate = message_passing_unit_v2(unary, pair, w, b, **kw)
        jax.block_until_ready((out, gate))
        ref_out, ref_gate = _reference(unary, pair, w, b)
        assert out.shape == ref_out.shape and gate.shape == ref_gate.shape
        assert jnp.allclose(out, ref_out, atol=1e-5, rtol=1e-5)
        assert jnp.allclose(gate, ref_gate, atol=1e-5, rtol=1e-5)

    # 1) Plain case: N=8.
    u8 = jax.random.normal(k_u, (8, INPUT_DIM), dtype=jnp.float32)
    p8 = jax.random.normal(k_p, (8, INPUT_DIM), dtype=jnp.float32)
    check(u8, p8)

    # 2) Broadcast unary (single row expanded over pair rows).
    check(u8[:1], p8)

    # 3) Broadcast pair (single row expanded over unary rows).
    check(u8, p8[:1])

    # 4) Multiple grid steps with a partial last tile: N=40, tile_m=16.
    u40 = jax.random.normal(k_u2, (40, INPUT_DIM), dtype=jnp.float32)
    p40 = jax.random.normal(k_p2, (40, INPUT_DIM), dtype=jnp.float32)
    check(u40, p40, tile_m=16)

    print("KERNEL_OK")
</pallas_src>

<mosaic_0001>
module attributes {stable_mosaic.version = 11 : i64} {
  func.func @_mpu_kernel(%arg0: i32, %arg1: memref<8x32xf32, #tpu.memory_space<vmem>>, %arg2: memref<8x32xf32, #tpu.memory_space<vmem>>, %arg3: memref<32x128xf32, #tpu.memory_space<vmem>>, %arg4: memref<1x128xf32, #tpu.memory_space<vmem>>, %arg5: memref<8x32xf32, #tpu.memory_space<vmem>>, %arg6: memref<8x1xf32, #tpu.memory_space<vmem>>) attributes {dimension_semantics = [#tpu.dimension_semantics<parallel>], iteration_bounds = array<i64: 1>, scalar_prefetch = 0 : i64, scratch_operands = 0 : i64, tpu.core_type = #tpu.core_type<tc>, window_params = [{transform_indices = @transform_0, window_bounds = array<i64: 8, 32>}, {transform_indices = @transform_1, window_bounds = array<i64: 8, 32>}, {pipeline_mode = #tpu.pipeline_mode<synchronous>, transform_indices = @transform_2, window_bounds = array<i64: 32, 128>}, {pipeline_mode = #tpu.pipeline_mode<synchronous>, transform_indices = @transform_3, window_bounds = array<i64: 1, 128>}, {transform_indices = @transform_4, window_bounds = array<i64: 8, 32>}, {transform_indices = @transform_5, window_bounds = array<i64: 8, 1>}]} {
    %c0 = arith.constant 0 : index
    %c0_0 = arith.constant 0 : index
    %0 = vector.load %arg1[%c0, %c0_0] : memref<8x32xf32, #tpu.memory_space<vmem>>, vector<8x32xf32>
    %cst = arith.constant 0.000000e+00 : f32
    %1 = vector.broadcast %cst : f32 to vector<8x32xf32>
    %2 = arith.maximumf %0, %1 : vector<8x32xf32>
    %c0_1 = arith.constant 0 : index
    %c0_2 = arith.constant 0 : index
    %3 = vector.load %arg2[%c0_1, %c0_2] : memref<8x32xf32, #tpu.memory_space<vmem>>, vector<8x32xf32>
    %cst_3 = arith.constant 0.000000e+00 : f32
    %4 = vector.broadcast %cst_3 : f32 to vector<8x32xf32>
    %5 = arith.maximumf %3, %4 : vector<8x32xf32>
    %c0_4 = arith.constant 0 : index
    %c0_5 = arith.constant 0 : index
    %6 = vector.load %arg3[%c0_4, %c0_5] : memref<32x128xf32, #tpu.memory_space<vmem>>, vector<32x128xf32>
    %c0_6 = arith.constant 0 : index
    %c0_7 = arith.constant 0 : index
    %7 = vector.load %arg4[%c0_6, %c0_7] : memref<1x128xf32, #tpu.memory_space<vmem>>, vector<1x128xf32>
    %8 = tpu.concatenate %2, %5 in 0 : vector<8x32xf32>, vector<8x32xf32> -> vector<16x32xf32>
    %cst_8 = arith.constant dense<0.000000e+00> : vector<16x128xf32>
    %9 = tpu.matmul %8, %6, %cst_8 {dimension_numbers = #tpu.dot_dimension_numbers<[1], [0], [0], [1], [0, 0, 1, 1], [], []>} : vector<16x32xf32>, vector<32x128xf32>, vector<16x128xf32> -> vector<16x128xf32>
    %10 = vector.broadcast %7 : vector<1x128xf32> to vector<16x128xf32>
    %11 = arith.addf %9, %10 : vector<16x128xf32>
    %12 = vector.extract_strided_slice %11 {offsets = [0, 0], sizes = [8, 128], strides = [1, 1]} : vector<16x128xf32> to vector<8x128xf32>
    %13 = vector.extract_strided_slice %11 {offsets = [8, 0], sizes = [8, 128], strides = [1, 1]} : vector<16x128xf32> to vector<8x128xf32>
    %14 = arith.mulf %12, %13 : vector<8x128xf32>
    %cst_9 = arith.constant dense<0.000000e+00> : vector<8xf32>
    %15 = vector.multi_reduction <add>, %14, %cst_9 [1] : vector<8x128xf32> to vector<8xf32>
    %16 = vector.shape_cast %15 : vector<8xf32> to vector<8x1xf32>
    %17 = arith.negf %16 : vector<8x1xf32>
    %18 = math.exp %17 : vector<8x1xf32>
    %cst_10 = arith.constant 1.000000e+00 : f32
    %19 = vector.broadcast %cst_10 : f32 to vector<8x1xf32>
    %20 = arith.addf %19, %18 : vector<8x1xf32>
    %21 = arith.divf %19, %20 : vector<8x1xf32>
    %c0_11 = arith.constant 0 : index
    %c0_12 = arith.constant 0 : index
    %22 = vector.load %arg6[%c0_11, %c0_12] : memref<8x1xf32, #tpu.memory_space<vmem>>, vector<8x1xf32>
    tpu.vector_store %arg6[%c0_11, %c0_12], %21 {strides = array<i32>} : memref<8x1xf32, #tpu.memory_space<vmem>>, vector<8x1xf32>,
    %c0_13 = arith.constant 0 : index
    %c0_14 = arith.constant 0 : index
    %23 = vector.load %arg2[%c0_13, %c0_14] : memref<8x32xf32, #tpu.memory_space<vmem>>, vector<8x32xf32>
    %24 = vector.broadcast %21 : vector<8x1xf32> to vector<8x32xf32>
    %25 = arith.mulf %23, %24 : vector<8x32xf32>
    %c0_15 = arith.constant 0 : index
    %c0_16 = arith.constant 0 : index
    %26 = vector.load %arg5[%c0_15, %c0_16] : memref<8x32xf32, #tpu.memory_space<vmem>>, vector<8x32xf32>
    tpu.vector_store %arg5[%c0_15, %c0_16], %25 {strides = array<i32>} : memref<8x32xf32, #tpu.memory_space<vmem>>, vector<8x32xf32>,
    return
  }
  func.func @transform_0(%arg0: i32) -> (i32, i32) {
    %c0_i32 = arith.constant 0 : i32
    %c0_i32_0 = arith.constant 0 : i32
    return %arg0, %c0_i32 : i32, i32
  }
  func.func @transform_1(%arg0: i32) -> (i32, i32) {
    %c0_i32 = arith.constant 0 : i32
    %c0_i32_0 = arith.constant 0 : i32
    return %arg0, %c0_i32 : i32, i32
  }
  func.func @transform_2(%arg0: i32) -> (i32, i32) {
    %c0_i32 = arith.constant 0 : i32
    %c0_i32_0 = arith.constant 0 : i32
    %c0_i32_1 = arith.constant 0 : i32
    return %c0_i32, %c0_i32_0 : i32, i32
  }
  func.func @transform_3(%arg0: i32) -> (i32, i32) {
    %c0_i32 = arith.constant 0 : i32
    %c0_i32_0 = arith.constant 0 : i32
    %c0_i32_1 = arith.constant 0 : i32
    return %c0_i32, %c0_i32_0 : i32, i32
  }
  func.func @transform_4(%arg0: i32) -> (i32, i32) {
    %c0_i32 = arith.constant 0 : i32
    %c0_i32_0 = arith.constant 0 : i32
    return %arg0, %c0_i32 : i32, i32
  }
  func.func @transform_5(%arg0: i32) -> (i32, i32) {
    %c0_i32 = arith.constant 0 : i32
    %c0_i32_0 = arith.constant 0 : i32
    return %arg0, %c0_i32 : i32, i32
  }
}

</mosaic_0001>

<bundles_post_ra>
// kernel: tpu_custom_call.1
= control target key start
LH: loop header
LB: loop body
LE: loop exit
PB: predicated region body
PF: predicated region fallthrough
CT: control target
= control target key end

     0   :  { %11 = vsyncpa [#allocation3], 0  ;;  %s414_s0 = inlined_call_operand.hbm [shape: f32[8,32], index: 0, kind: input, shape index: {}]   ;;  %s415_s1 = inlined_call_operand.hbm [shape: f32[8,32], index: 1, kind: input, shape index: {}]   ;;  %s416_s2 = inlined_call_operand.hbm [shape: f32[32,128], index: 2, kind: input, shape index: {}]   ;;  %s417_s3 = inlined_call_operand.vmem [shape: f32[1,128], index: 3, kind: input, shape index: {}]   ;;  %s418_s4 = inlined_call_operand.hbm [shape: f32[8,32], index: 4, kind: output, shape index: {0}]   ;;  %s419_s5 = inlined_call_operand.vmem [shape: f32[8,1], index: 5, kind: output, shape index: {1}]  }
   0x1   :  { %12 = vsyncpa [#allocation6], 0 }
   0x2   :  { %13 = vsyncpa [#allocation4], 0  ;;  %s321_s18 = smov [#allocation5]   ;;  %s322_s20 = smov [#allocation2]  }
   0x3   :  { %s30_s19 = sshll.u32 %s321_s18, 4  ;;  %s20_s21 = sshll.u32 %s322_s20, 4  ;;  %s31_s19 = int_to_ptr.vmem [resolvable:$true] %s30_s19  ;;  %s21_s21 = int_to_ptr.vmem [resolvable:$true] %s20_s21 }
   0x4   :  { %s227_s24 = scalar_lea.hbm %s415_s1, 128 }
   0x5   :  { %p228_p0 = scmp.ne.s32.totalorder %s415_s1, %s227_s24  ;;  %p231_p1 = scmp.lt.u32.totalorder %s227_s24, %s415_s1 }
   0x7   :  { %p233_p2 = pnand %p231_p1, %p228_p0 }
   0x9   :  { %236 = shalt.err (!%p233_p2)
}
   0xa   :  { %s237_s29 = scalar_lea.vmem %s31_s19, 128  ;;  %p242_p4 = scmp.lt.s32.totalorder %s31_s19, %s31_s19 }
   0xb   :  { %p238_p3 = scmp.ne.s32.totalorder %s31_s19, %s237_s29  ;;  %p243_p5 = scmp.lt.s32.totalorder %s237_s29, %s237_s29 }
   0xd   :  { %p244_p6 = por %p243_p5, %p242_p4 }
   0xf   :  { %p245_p7 = pnand %p244_p6, %p238_p3 }
  0x11   :  { %248 = shalt.err (!%p245_p7)
}
  0x12   :  { %33 = dma.hbm_to_vmem [thread:$0]  %s415_s1, 128, %s31_s19, [#allocation6]  }
  0x13   :  { %s249_s9 = scalar_lea.hbm %s414_s0, 128 }
  0x14   :  { %p250_p8 = scmp.ne.s32.totalorder %s414_s0, %s249_s9  ;;  %p253_p9 = scmp.lt.u32.totalorder %s249_s9, %s414_s0 }
  0x16   :  { %p255_p10 = pnand %p253_p9, %p250_p8 }
  0x18   :  { %258 = shalt.err (!%p255_p10)
}
  0x19   :  { %s259_s14 = scalar_lea.vmem %s21_s21, 128  ;;  %p264_p12 = scmp.lt.s32.totalorder %s21_s21, %s21_s21 }
  0x1a   :  { %p260_p11 = scmp.ne.s32.totalorder %s21_s21, %s259_s14  ;;  %p265_p13 = scmp.lt.s32.totalorder %s259_s14, %s259_s14 }
  0x1c   :  { %p266_p0 = por %p265_p13, %p264_p12 }
  0x1e   :  { %p267_p1 = pnand %p266_p0, %p260_p11 }
  0x20   :  { %270 = shalt.err (!%p267_p1)
}
  0x21   :  { %23 = dma.hbm_to_vmem [thread:$0]  %s414_s0, 128, %s21_s21, [#allocation3]  }
  0x22   :  { %s323_s16 = smov [#allocation7]   ;;  %s271_s20 = scalar_lea.hbm %s416_s2, 512 }
  0x23   :  { %s39_s17 = sshll.u32 %s323_s16, 4  ;;  %p272_p2 = scmp.ne.s32.totalorder %s416_s2, %s271_s20  ;;  %s40_s17 = int_to_ptr.vmem [resolvable:$true] %s39_s17 }
  0x24   :  { %p275_p3 = scmp.lt.u32.totalorder %s271_s20, %s416_s2 }
  0x26   :  { %p277_p4 = pnand %p275_p3, %p272_p2 }
  0x28   :  { %280 = shalt.err (!%p277_p4)
}
  0x29   :  { %s281_s26 = scalar_lea.vmem %s40_s17, 512  ;;  %p286_p6 = scmp.lt.s32.totalorder %s40_s17, %s40_s17 }
  0x2a   :  { %p282_p5 = scmp.ne.s32.totalorder %s40_s17, %s281_s26  ;;  %p287_p7 = scmp.lt.s32.totalorder %s281_s26, %s281_s26 }
  0x2c   :  { %p288_p8 = por %p287_p7, %p286_p6 }
  0x2e   :  { %p289_p9 = pnand %p288_p8, %p282_p5 }
  0x30   :  { %292 = shalt.err (!%p289_p9)
}
  0x31   :  { %s324_s0 = smov 128   ;;  %s325_s21 = smov 8  }
  0x32   :  { %45 = dma.hbm_to_vmem [thread:$0]  %s416_s2, 512, %s40_s17, [#allocation6], %s324_s0, %s324_s0, %s325_s21  }
  0x33   :  { %315 = dma.done.wait [#allocation3], 128  }
  0x34   :  { %316 = vsyncadd [#allocation3], 4294967168 }
  0x35   :  { %317 = dma.done.wait [#allocation6], 640  }
  0x36   :  { %318 = vsyncadd [#allocation6], 4294966656  ;;  %v61_v0 = vld [vmem:[#allocation7] sm:$0xff]  ;;  %v62_v1 = vld [vmem:[#allocation7 + $0x8] sm:$0xff]  ;;  %vm72_vm0 = vcmask 261120   ;;  %vm163_vm1 = vcmask 7168  }
  0x37   :  { %v63_v2 = vld [vmem:[#allocation7 + $0x10] sm:$0xff]  ;;  %v209_v3 = vpack.c.bf16 %v62_v1, %v61_v0  ;;  %v64_v4 = vld [vmem:[#allocation7 + $0x18] sm:$0xff]  ;;  %s326_s30 = smov [#allocation8]  }
  0x38   :  { %v57_v5 = vld [vmem:[#allocation2] sm:$0xff]  ;;  %v213_v6 = vpack.c.bf16 %v64_v4, %v63_v2  ;;  %v59_v8 = vld [vmem:[#allocation5] sm:$0xff]  ;;  %s174_s6 = sshll.u32 %s326_s30, 4  ;;  %s175_s6 = int_to_ptr.vmem [resolvable:$true] %s174_s6 }
  0x39   :  { %v58_v7 = vmax.f32 %v57_v5, 0.0  ;;  %210 = vmatprep.subr.bf16.mxu0 %v209_v3  ;;  %v60_v9 = vmax.f32 %v59_v8, 0.0  ;;  %v188_v10 = vld [vmem:[%s417_s3] ss:$0 sm:$0xff]  ;;  %s293_s3 = scalar_lea.vmem %s175_s6, 128  ;;  %p298_p11 = scmp.lt.s32.totalorder %s175_s6, %s175_s6 }
  0x3a   :  { %212 = vmatpush3.bf16.msra.mxu0 %v209_v3  ;;  %p294_p10 = scmp.ne.s32.totalorder %s175_s6, %s293_s3  ;;  %p299_p12 = scmp.lt.s32.totalorder %s293_s3, %s293_s3 }
  0x3b   :  { %206 = vmatprep.mubr.msk.f32.mxu0 %vm72_vm0, %v58_v7  ;;  %214 = vmatprep.subr.bf16.mxu0 %v213_v6 }
  0x3c   :  { %p300_p13 = por %p299_p12, %p298_p11 }
  0x3e   :  { %216 = vmatpush3.bf16.msra.mxu0 %v213_v6  ;;  %p301_p0 = pnand %p300_p13, %p294_p10 }
  0x41   :  { %207 = vmatmul.mubr.msk.f32.vlgmr.msra.gmra.mrb[0].mxu0 %vm72_vm0, %v60_v9 }
 0x114   :  { %v208_v11 = vpop.f32.mrb[0].mxu0 }
 0x115   :  { %v151_v12 = vadd.f32 %v208_v11, %v188_v10  ;;  %v145_v13 = vpop.f32.mrb[1].mxu0 }
 0x116   :  { %v146_v14 = vadd.f32 %v188_v10, %v145_v13 }
 0x118   :  { %v154_v15 = vmul.f32 %v151_v12, %v146_v14 }
 0x11a   :  { %155 = vadd.xlane.f32.xlu0 %v154_v15 }
 0x1a7   :  { %v156_v16 = vpop.xlane.xlu0 %155 }
 0x1a8   :  { %v191_v17 = vmul.f32 -1.442695, %v156_v16 }
 0x1aa   :  { %223 = vpow2.f32 %v191_v17 }
 0x1b4   :  { %v224_v18 = vpop.eup %223 }
 0x1b5   :  { %v160_v19 = vadd.f32 1.0, %v224_v18 }
 0x1b7   :  { %225 = vrcp.f32 %v160_v19 }
 0x1c1   :  { %v226_v20 = vpop.eup %225 }
 0x1c2   :  { %164 = vst.msk [vmem:[%s419_s5] sm:$0xff] %vm163_vm1, %v226_v20  ;;  %v166_v21 = vmul.f32 %v226_v20, %v59_v8 }
 0x1c4   :  { %167 = vst.msk [vmem:[#allocation8] sm:$0xff] %vm72_vm0, %v166_v21 }
 0x1c5   :  { %304 = shalt.err (!%p301_p0)
}
 0x1c6   :  { %s305_s11 = scalar_lea.hbm %s418_s4, 128 }
 0x1c7   :  { %p306_p1 = scmp.ne.s32.totalorder %s418_s4, %s305_s11  ;;  %p309_p2 = scmp.lt.u32.totalorder %s305_s11, %s418_s4 }
 0x1c9   :  { %p311_p3 = pnand %p309_p2, %p306_p1 }
 0x1cb   :  { %314 = shalt.err (!%p311_p3)
}
 0x1cc   :  { %177 = dma.vmem_to_hbm [thread:$0]  %s175_s6, 128, %s418_s4, [#allocation4]  }
 0x1cd   :  { %319 = dma.done.wait [#allocation4], 128  }
 0x1ce   :  { %320 = vsyncadd [#allocation4], 4294967168 }
 0x1cf   :  { %185 = vsyncpa [#allocation3], 1 }
 0x1d0   :  { %186 = vsyncpa [#allocation6], 1 }
 0x1d1   :  { %187 = vsyncpa [#allocation4], 1 }

</bundles_post_ra>
